<compile_context>
chip_gen: v6e
topology: v6e:2x2x1
jax: 0.10.0
libtpu: 0.0.40
codegen_flags: <defaults>
</compile_context>

<pallas_src>
import functools

import jax
import jax.numpy as jnp
from jax.experimental import pallas as pl
from jax.experimental.pallas import tpu as pltpu

BN_EPS = 1e-5
LANE = 128
SUBLANE = 8

_VMEM = pl.BlockSpec(memory_space=pltpu.MemorySpace.VMEM)


def _round_up(x, m):
    return ((x + m - 1) // m) * m


# ----------------------------------------------------------------------------
# Fused Pallas kernel: whole VAE + reparam + classifier forward pass
# ----------------------------------------------------------------------------
def _fused_forward_kernel(xe_ref, w_ref, b_ref, out_ref, *, P, d3):
    b = b_ref[...]                      # (8, P) all biases, one load
    x = xe_ref[:, :P]                   # padded input  (lanes 0..P-1)
    eps = xe_ref[:, P:]                 # padded noise  (lanes P..2P-1)

    def lin(a, i):
        # layer i: a @ W_i + b_i   (BN already folded into W_i / b_i)
        return jnp.dot(a, w_ref[i], preferred_element_type=jnp.float32) + b[i:i + 1, :]

    # ---- VAE encoder: Linear -> BN(folded) -> ReLU -> Dropout(eval: identity)
    h = jnp.maximum(lin(x, 0), 0.0)

    # ---- mean / log_var heads (each its own 128-lane-aligned block)
    mean = lin(h, 1)
    log_var = lin(h, 2)

    # ---- reparameterization: z = mean + eps * exp(0.5 * log_var)
    z = mean + eps * jnp.exp(0.5 * log_var)

    # ---- VAE decoder: Linear -> BN -> ReLU -> Dropout(id) -> Linear -> BN -> Sigmoid
    d1 = jnp.maximum(lin(z, 3), 0.0)
    y2 = lin(d1, 4)
    # exact, numerically stable sigmoid (PyTorch parity; recon guaranteed in [0,1])
    e = jnp.exp(-jnp.abs(y2))
    recon = jnp.where(y2 >= 0.0, 1.0 / (1.0 + e), e / (1.0 + e))

    # ---- classifier (NeuralNetwork) on `mean`
    n1 = jnp.maximum(lin(mean, 5), 0.0)
    n2 = jnp.maximum(lin(n1, 6), 0.0)
    logits = lin(n2, 7)
    # mask padded class columns so softmax matches torch over the real d3 classes
    col = jax.lax.broadcasted_iota(jnp.int32, logits.shape, 1)
    logits = jnp.where(col < d3, logits, jnp.float32(-1e30))
    mx = jnp.max(logits, axis=-1, keepdims=True)
    ex = jnp.exp(logits - mx)
    probs = ex / jnp.sum(ex, axis=-1, keepdims=True)   # exact softmax

    # ---- single lane-dense output slab: [mean | log_var | recon | probs]
    out_ref[:, 0 * P:1 * P] = mean
    out_ref[:, 1 * P:2 * P] = log_var
    out_ref[:, 2 * P:3 * P] = recon
    out_ref[:, 3 * P:4 * P] = probs


def fused_forward(packed, x, eps):
    """One pallas_call for the full NewFirstStage forward (eval mode)."""
    w_stack, b_stack = packed["w"], packed["b"]
    d_in, d_lat, d3 = packed["dims"]
    P = w_stack.shape[-1]
    B = x.shape[0]
    Bp = _round_up(max(B, SUBLANE), SUBLANE)

    # pack padded x | eps into one lane-dense slab (one input DMA descriptor)
    xe = jnp.zeros((Bp, 2 * P), jnp.float32)
    xe = xe.at[:B, :d_in].set(x.astype(jnp.float32))
    xe = xe.at[:B, P:P + d_lat].set(eps.astype(jnp.float32))

    kernel = functools.partial(_fused_forward_kernel, P=P, d3=d3)
    out = pl.pallas_call(
        kernel,
        out_shape=jax.ShapeDtypeStruct((Bp, 4 * P), jnp.float32),
        in_specs=[_VMEM, _VMEM, _VMEM],
        out_specs=_VMEM,
    )(xe, w_stack, b_stack)

    mean = out[:B, 0 * P:0 * P + d_lat]
    log_var = out[:B, 1 * P:1 * P + d_lat]
    recon_x = out[:B, 2 * P:2 * P + d_in]
    probs = out[:B, 3 * P:3 * P + d3]
    return mean, log_var, recon_x, probs


# ----------------------------------------------------------------------------
# Parameter construction (deterministic, mimics the PyTorch module shapes)
# ----------------------------------------------------------------------------
def _init_linear(key, din, dout):
    k1, k2 = jax.random.split(key)
    bound = 1.0 / jnp.sqrt(din)
    w = jax.random.uniform(k1, (din, dout), jnp.float32, -bound, bound)
    b = jax.random.uniform(k2, (1, dout), jnp.float32, -bound, bound)
    return w, b


def _init_bn(key, dim):
    k1, k2 = jax.random.split(key)
    gamma = jnp.ones((1, dim), jnp.float32)
    beta = jnp.zeros((1, dim), jnp.float32)
    rm = 0.1 * jax.random.normal(k1, (1, dim), jnp.float32)
    rv = jax.random.uniform(k2, (1, dim), jnp.float32, 0.5, 1.5)
    return (gamma, beta, rm, rv)


def init_vae_params(key, dims):
    """VAE with dims = [d_in, d_hidden, d_latent] (len==3 matches the module)."""
    d_in, d_h, d_lat = dims
    keys = jax.random.split(key, 10)
    p = {}
    p["enc_w"], p["enc_b"] = _init_linear(keys[0], d_in, d_h)
    p["enc_bn"] = _init_bn(keys[1], d_h)
    p["mean_w"], p["mean_b"] = _init_linear(keys[2], d_h, d_lat)
    p["mean_bn"] = _init_bn(keys[3], d_lat)
    p["lv_w"], p["lv_b"] = _init_linear(keys[4], d_h, d_lat)
    p["lv_bn"] = _init_bn(keys[5], d_lat)
    p["dec1_w"], p["dec1_b"] = _init_linear(keys[6], d_lat, d_h)
    p["dec1_bn"] = _init_bn(keys[7], d_h)
    p["dec2_w"], p["dec2_b"] = _init_linear(keys[8], d_h, d_in)
    p["dec2_bn"] = _init_bn(keys[9], d_in)
    return p


def init_nn_params(key, dims):
    """NeuralNetwork with dims = [d0, d1, d2, d3]."""
    d0, d1, d2, d3 = dims
    keys = jax.random.split(key, 5)
    p = {}
    p["w1"], p["b1"] = _init_linear(keys[0], d0, d1)
    p["bn1"] = _init_bn(keys[1], d1)
    p["w2"], p["b2"] = _init_linear(keys[2], d1, d2)
    p["bn2"] = _init_bn(keys[3], d2)
    p["w3"], p["b3"] = _init_linear(keys[4], d2, d3)
    return p


# ----------------------------------------------------------------------------
# Parameter prep: fold eval-mode BatchNorm, zero-pad to lane-aligned P, and
# pack all 8 layers into two contiguous slabs (one-time cost, outside kernel).
# ----------------------------------------------------------------------------
def _fold_bn(w, b, bn):
    gamma, beta, rm, rv = bn
    scale = gamma * jax.lax.rsqrt(rv + BN_EPS)          # (1, Dout)
    return w * scale, (b - rm) * scale + beta


def prepare_packed_params(vae_p, nn_p):
    layers = [
        _fold_bn(vae_p["enc_w"], vae_p["enc_b"], vae_p["enc_bn"]),    # 0 encoder
        _fold_bn(vae_p["mean_w"], vae_p["mean_b"], vae_p["mean_bn"]), # 1 mean head
        _fold_bn(vae_p["lv_w"], vae_p["lv_b"], vae_p["lv_bn"]),       # 2 log_var head
        _fold_bn(vae_p["dec1_w"], vae_p["dec1_b"], vae_p["dec1_bn"]), # 3 decoder L1
        _fold_bn(vae_p["dec2_w"], vae_p["dec2_b"], vae_p["dec2_bn"]), # 4 decoder L2
        _fold_bn(nn_p["w1"], nn_p["b1"], nn_p["bn1"]),                # 5 NN L1
        _fold_bn(nn_p["w2"], nn_p["b2"], nn_p["bn2"]),                # 6 NN L2
        (nn_p["w3"], nn_p["b3"]),                                     # 7 NN L3 (no BN)
    ]
    dim_max = max(max(w.shape) for w, _ in layers)
    P = _round_up(dim_max, LANE)

    w_stack = jnp.zeros((len(layers), P, P), jnp.float32)
    b_stack = jnp.zeros((len(layers), P), jnp.float32)
    for i, (w, bias) in enumerate(layers):
        w_stack = w_stack.at[i, : w.shape[0], : w.shape[1]].set(w)
        b_stack = b_stack.at[i, : bias.shape[1]].set(bias[0])

    d_in = vae_p["enc_w"].shape[0]
    d_lat = vae_p["mean_w"].shape[1]
    d3 = nn_p["w3"].shape[1]
    return dict(w=w_stack, b=b_stack, dims=(d_in, d_lat, d3))


# ----------------------------------------------------------------------------
# Pure-JAX reference (unfused, unfolded) for correctness checking
# ----------------------------------------------------------------------------
def _bn_eval(x, bn):
    gamma, beta, rm, rv = bn
    return (x - rm) * gamma * jax.lax.rsqrt(rv + BN_EPS) + beta


def reference_forward(vae_p, nn_p, x, eps):
    h = jax.nn.relu(_bn_eval(x @ vae_p["enc_w"] + vae_p["enc_b"], vae_p["enc_bn"]))
    mean = _bn_eval(h @ vae_p["mean_w"] + vae_p["mean_b"], vae_p["mean_bn"])
    log_var = _bn_eval(h @ vae_p["lv_w"] + vae_p["lv_b"], vae_p["lv_bn"])
    z = mean + eps * jnp.exp(0.5 * log_var)
    d1 = jax.nn.relu(_bn_eval(z @ vae_p["dec1_w"] + vae_p["dec1_b"], vae_p["dec1_bn"]))
    recon = jax.nn.sigmoid(_bn_eval(d1 @ vae_p["dec2_w"] + vae_p["dec2_b"], vae_p["dec2_bn"]))
    n1 = jax.nn.relu(_bn_eval(mean @ nn_p["w1"] + nn_p["b1"], nn_p["bn1"]))
    n2 = jax.nn.relu(_bn_eval(n1 @ nn_p["w2"] + nn_p["b2"], nn_p["bn2"]))
    out = jax.nn.softmax(n2 @ nn_p["w3"] + nn_p["b3"], axis=1)
    return mean, log_var, recon, out


# ----------------------------------------------------------------------------
# Forward pass mirroring NewFirstStage.forward(x, mode)
# ----------------------------------------------------------------------------
def new_first_stage_forward(packed_list, x_list, eps_list, mode):
    """mode is a Python int (0/1/2) selecting which VAE runs, like self.action.
    TODO(synk): when all three modes are needed (train_nnet/test paths) or the
    batch grows, stack modes / shard a B grid with dimension_semantics=("parallel",)
    to use both v7x TensorCores; a single call at small B is launch-bound."""
    return fused_forward(packed_list[mode], x_list[mode], eps_list[mode])


# ----------------------------------------------------------------------------
# Main
# ----------------------------------------------------------------------------
if __name__ == "__main__":
    key = jax.random.PRNGKey(0)
    k_p1, k_p2, k_p3, k_nn, k_x1, k_x2, k_x3, k_e1, k_e2, k_e3 = \
        jax.random.split(key, 10)

    B = 8
    VAE1_DIMS = [32, 16, 8]
    VAE2_DIMS = [40, 20, 8]
    VAE3_DIMS = [24, 16, 8]
    NN_DIMS = [8, 16, 16, 4]   # NN[0] == latent dim of selected VAE

    vae_params = [
        init_vae_params(k_p1, VAE1_DIMS),
        init_vae_params(k_p2, VAE2_DIMS),
        init_vae_params(k_p3, VAE3_DIMS),
    ]
    nn_params = init_nn_params(k_nn, NN_DIMS)

    # One-time parameter prep: fold BN, pad to 128 lanes, pack into 2 slabs/mode.
    packed_list = [prepare_packed_params(p, nn_params) for p in vae_params]

    x_list = [
        jax.random.normal(k_x1, (B, VAE1_DIMS[0]), jnp.float32),
        jax.random.normal(k_x2, (B, VAE2_DIMS[0]), jnp.float32),
        jax.random.normal(k_x3, (B, VAE3_DIMS[0]), jnp.float32),
    ]
    # eps for reparameterization (torch.randn_like done outside the kernel)
    eps_list = [
        jax.random.normal(k_e1, (B, VAE1_DIMS[2]), jnp.float32),
        jax.random.normal(k_e2, (B, VAE2_DIMS[2]), jnp.float32),
        jax.random.normal(k_e3, (B, VAE3_DIMS[2]), jnp.float32),
    ]

    mode = 0
    mean, log_var, recon_x, out = new_first_stage_forward(
        packed_list, x_list, eps_list, mode)
    jax.block_until_ready((mean, log_var, recon_x, out))

    # shape checks
    assert mean.shape == (B, VAE1_DIMS[2])
    assert log_var.shape == (B, VAE1_DIMS[2])
    assert recon_x.shape == (B, VAE1_DIMS[0])
    assert out.shape == (B, NN_DIMS[3])

    # exact-math sanity: softmax rows sum to 1, sigmoid outputs in [0, 1]
    assert bool(jnp.all(jnp.abs(jnp.sum(out, axis=1) - 1.0) < 1e-4))
    assert bool(jnp.all((recon_x >= 0.0) & (recon_x <= 1.0)))

    # parity with the unfused pure-JAX reference of the PyTorch eval forward
    r_mean, r_lv, r_recon, r_out = reference_forward(
        vae_params[mode], nn_params, x_list[mode], eps_list[mode])
    assert bool(jnp.allclose(mean, r_mean, atol=5e-3, rtol=5e-3))
    assert bool(jnp.allclose(log_var, r_lv, atol=5e-3, rtol=5e-3))
    assert bool(jnp.allclose(recon_x, r_recon, atol=5e-3, rtol=5e-3))
    assert bool(jnp.allclose(out, r_out, atol=5e-3, rtol=5e-3))

    print("KERNEL_OK")
</pallas_src>

<mosaic_0001>
module attributes {stable_mosaic.version = 11 : i64} {
  func.func @_fused_forward_kernel(%arg0: memref<8x256xf32, #tpu.memory_space<vmem>>, %arg1: memref<8x128x128xf32, #tpu.memory_space<vmem>>, %arg2: memref<8x128xf32, #tpu.memory_space<vmem>>, %arg3: memref<8x512xf32, #tpu.memory_space<vmem>>) attributes {dimension_semantics = [], scalar_prefetch = 0 : i64, scratch_operands = 0 : i64, tpu.core_type = #tpu.core_type<tc>} {
    %c0 = arith.constant 0 : index
    %c0_0 = arith.constant 0 : index
    %0 = vector.load %arg2[%c0, %c0_0] : memref<8x128xf32, #tpu.memory_space<vmem>>, vector<8x128xf32>
    %c0_1 = arith.constant 0 : index
    %c0_2 = arith.constant 0 : index
    %1 = vector.load %arg0[%c0_1, %c0_2] : memref<8x256xf32, #tpu.memory_space<vmem>>, vector<8x128xf32>
    %c0_3 = arith.constant 0 : index
    %c128 = arith.constant 128 : index
    %2 = vector.load %arg0[%c0_3, %c128] : memref<8x256xf32, #tpu.memory_space<vmem>>, vector<8x128xf32>
    %c0_4 = arith.constant 0 : index
    %c0_5 = arith.constant 0 : index
    %c0_6 = arith.constant 0 : index
    %3 = vector.load %arg1[%c0_4, %c0_5, %c0_6] : memref<8x128x128xf32, #tpu.memory_space<vmem>>, vector<1x128x128xf32>
    %4 = vector.shape_cast %3 : vector<1x128x128xf32> to vector<128x128xf32>
    %cst = arith.constant dense<0.000000e+00> : vector<8x128xf32>
    %5 = tpu.matmul %1, %4, %cst {dimension_numbers = #tpu.dot_dimension_numbers<[1], [0], [0], [1], [0, 0, 1, 1], [], []>} : vector<8x128xf32>, vector<128x128xf32>, vector<8x128xf32> -> vector<8x128xf32>
    %6 = vector.extract_strided_slice %0 {offsets = [0, 0], sizes = [1, 128], strides = [1, 1]} : vector<8x128xf32> to vector<1x128xf32>
    %7 = vector.broadcast %6 : vector<1x128xf32> to vector<8x128xf32>
    %8 = arith.addf %5, %7 : vector<8x128xf32>
    %cst_7 = arith.constant 0.000000e+00 : f32
    %9 = vector.broadcast %cst_7 : f32 to vector<8x128xf32>
    %10 = arith.maximumf %8, %9 : vector<8x128xf32>
    %c1 = arith.constant 1 : index
    %c0_8 = arith.constant 0 : index
    %c0_9 = arith.constant 0 : index
    %11 = vector.load %arg1[%c1, %c0_8, %c0_9] : memref<8x128x128xf32, #tpu.memory_space<vmem>>, vector<1x128x128xf32>
    %12 = vector.shape_cast %11 : vector<1x128x128xf32> to vector<128x128xf32>
    %cst_10 = arith.constant dense<0.000000e+00> : vector<8x128xf32>
    %13 = tpu.matmul %10, %12, %cst_10 {dimension_numbers = #tpu.dot_dimension_numbers<[1], [0], [0], [1], [0, 0, 1, 1], [], []>} : vector<8x128xf32>, vector<128x128xf32>, vector<8x128xf32> -> vector<8x128xf32>
    %14 = vector.extract_strided_slice %0 {offsets = [1, 0], sizes = [1, 128], strides = [1, 1]} : vector<8x128xf32> to vector<1x128xf32>
    %15 = vector.broadcast %14 : vector<1x128xf32> to vector<8x128xf32>
    %16 = arith.addf %13, %15 : vector<8x128xf32>
    %c2 = arith.constant 2 : index
    %c0_11 = arith.constant 0 : index
    %c0_12 = arith.constant 0 : index
    %17 = vector.load %arg1[%c2, %c0_11, %c0_12] : memref<8x128x128xf32, #tpu.memory_space<vmem>>, vector<1x128x128xf32>
    %18 = vector.shape_cast %17 : vector<1x128x128xf32> to vector<128x128xf32>
    %cst_13 = arith.constant dense<0.000000e+00> : vector<8x128xf32>
    %19 = tpu.matmul %10, %18, %cst_13 {dimension_numbers = #tpu.dot_dimension_numbers<[1], [0], [0], [1], [0, 0, 1, 1], [], []>} : vector<8x128xf32>, vector<128x128xf32>, vector<8x128xf32> -> vector<8x128xf32>
    %20 = vector.extract_strided_slice %0 {offsets = [2, 0], sizes = [1, 128], strides = [1, 1]} : vector<8x128xf32> to vector<1x128xf32>
    %21 = vector.broadcast %20 : vector<1x128xf32> to vector<8x128xf32>
    %22 = arith.addf %19, %21 : vector<8x128xf32>
    %cst_14 = arith.constant 5.000000e-01 : f32
    %23 = vector.broadcast %cst_14 : f32 to vector<8x128xf32>
    %24 = arith.mulf %23, %22 : vector<8x128xf32>
    %25 = math.exp %24 : vector<8x128xf32>
    %26 = arith.mulf %2, %25 : vector<8x128xf32>
    %27 = arith.addf %16, %26 : vector<8x128xf32>
    %c3 = arith.constant 3 : index
    %c0_15 = arith.constant 0 : index
    %c0_16 = arith.constant 0 : index
    %28 = vector.load %arg1[%c3, %c0_15, %c0_16] : memref<8x128x128xf32, #tpu.memory_space<vmem>>, vector<1x128x128xf32>
    %29 = vector.shape_cast %28 : vector<1x128x128xf32> to vector<128x128xf32>
    %cst_17 = arith.constant dense<0.000000e+00> : vector<8x128xf32>
    %30 = tpu.matmul %27, %29, %cst_17 {dimension_numbers = #tpu.dot_dimension_numbers<[1], [0], [0], [1], [0, 0, 1, 1], [], []>} : vector<8x128xf32>, vector<128x128xf32>, vector<8x128xf32> -> vector<8x128xf32>
    %31 = vector.extract_strided_slice %0 {offsets = [3, 0], sizes = [1, 128], strides = [1, 1]} : vector<8x128xf32> to vector<1x128xf32>
    %32 = vector.broadcast %31 : vector<1x128xf32> to vector<8x128xf32>
    %33 = arith.addf %30, %32 : vector<8x128xf32>
    %cst_18 = arith.constant 0.000000e+00 : f32
    %34 = vector.broadcast %cst_18 : f32 to vector<8x128xf32>
    %35 = arith.maximumf %33, %34 : vector<8x128xf32>
    %c4 = arith.constant 4 : index
    %c0_19 = arith.constant 0 : index
    %c0_20 = arith.constant 0 : index
    %36 = vector.load %arg1[%c4, %c0_19, %c0_20] : memref<8x128x128xf32, #tpu.memory_space<vmem>>, vector<1x128x128xf32>
    %37 = vector.shape_cast %36 : vector<1x128x128xf32> to vector<128x128xf32>
    %cst_21 = arith.constant dense<0.000000e+00> : vector<8x128xf32>
    %38 = tpu.matmul %35, %37, %cst_21 {dimension_numbers = #tpu.dot_dimension_numbers<[1], [0], [0], [1], [0, 0, 1, 1], [], []>} : vector<8x128xf32>, vector<128x128xf32>, vector<8x128xf32> -> vector<8x128xf32>
    %39 = vector.extract_strided_slice %0 {offsets = [4, 0], sizes = [1, 128], strides = [1, 1]} : vector<8x128xf32> to vector<1x128xf32>
    %40 = vector.broadcast %39 : vector<1x128xf32> to vector<8x128xf32>
    %41 = arith.addf %38, %40 : vector<8x128xf32>
    %42 = math.absf %41 : vector<8x128xf32>
    %cst_22 = arith.constant 0.000000e+00 : f32
    %43 = vector.broadcast %cst_22 : f32 to vector<8x128xf32>
    %44 = arith.subf %43, %42 : vector<8x128xf32>
    %45 = math.exp %44 : vector<8x128xf32>
    %cst_23 = arith.constant 0.000000e+00 : f32
    %46 = vector.broadcast %cst_23 : f32 to vector<8x128xf32>
    %47 = arith.cmpf oge, %41, %46 : vector<8x128xf32>
    %cst_24 = arith.constant 1.000000e+00 : f32
    %48 = vector.broadcast %cst_24 : f32 to vector<8x128xf32>
    %49 = arith.addf %48, %45 : vector<8x128xf32>
    %cst_25 = arith.constant 1.000000e+00 : f32
    %50 = vector.broadcast %cst_25 : f32 to vector<8x128xf32>
    %51 = arith.divf %50, %49 : vector<8x128xf32>
    %cst_26 = arith.constant 1.000000e+00 : f32
    %52 = vector.broadcast %cst_26 : f32 to vector<8x128xf32>
    %53 = arith.addf %52, %45 : vector<8x128xf32>
    %54 = arith.divf %45, %53 : vector<8x128xf32>
    %55 = arith.select %47, %51, %54 : vector<8x128xi1>, vector<8x128xf32>
    %c5 = arith.constant 5 : index
    %c0_27 = arith.constant 0 : index
    %c0_28 = arith.constant 0 : index
    %56 = vector.load %arg1[%c5, %c0_27, %c0_28] : memref<8x128x128xf32, #tpu.memory_space<vmem>>, vector<1x128x128xf32>
    %57 = vector.shape_cast %56 : vector<1x128x128xf32> to vector<128x128xf32>
    %cst_29 = arith.constant dense<0.000000e+00> : vector<8x128xf32>
    %58 = tpu.matmul %16, %57, %cst_29 {dimension_numbers = #tpu.dot_dimension_numbers<[1], [0], [0], [1], [0, 0, 1, 1], [], []>} : vector<8x128xf32>, vector<128x128xf32>, vector<8x128xf32> -> vector<8x128xf32>
    %59 = vector.extract_strided_slice %0 {offsets = [5, 0], sizes = [1, 128], strides = [1, 1]} : vector<8x128xf32> to vector<1x128xf32>
    %60 = vector.broadcast %59 : vector<1x128xf32> to vector<8x128xf32>
    %61 = arith.addf %58, %60 : vector<8x128xf32>
    %cst_30 = arith.constant 0.000000e+00 : f32
    %62 = vector.broadcast %cst_30 : f32 to vector<8x128xf32>
    %63 = arith.maximumf %61, %62 : vector<8x128xf32>
    %c6 = arith.constant 6 : index
    %c0_31 = arith.constant 0 : index
    %c0_32 = arith.constant 0 : index
    %64 = vector.load %arg1[%c6, %c0_31, %c0_32] : memref<8x128x128xf32, #tpu.memory_space<vmem>>, vector<1x128x128xf32>
    %65 = vector.shape_cast %64 : vector<1x128x128xf32> to vector<128x128xf32>
    %cst_33 = arith.constant dense<0.000000e+00> : vector<8x128xf32>
    %66 = tpu.matmul %63, %65, %cst_33 {dimension_numbers = #tpu.dot_dimension_numbers<[1], [0], [0], [1], [0, 0, 1, 1], [], []>} : vector<8x128xf32>, vector<128x128xf32>, vector<8x128xf32> -> vector<8x128xf32>
    %67 = vector.extract_strided_slice %0 {offsets = [6, 0], sizes = [1, 128], strides = [1, 1]} : vector<8x128xf32> to vector<1x128xf32>
    %68 = vector.broadcast %67 : vector<1x128xf32> to vector<8x128xf32>
    %69 = arith.addf %66, %68 : vector<8x128xf32>
    %cst_34 = arith.constant 0.000000e+00 : f32
    %70 = vector.broadcast %cst_34 : f32 to vector<8x128xf32>
    %71 = arith.maximumf %69, %70 : vector<8x128xf32>
    %c7 = arith.constant 7 : index
    %c0_35 = arith.constant 0 : index
    %c0_36 = arith.constant 0 : index
    %72 = vector.load %arg1[%c7, %c0_35, %c0_36] : memref<8x128x128xf32, #tpu.memory_space<vmem>>, vector<1x128x128xf32>
    %73 = vector.shape_cast %72 : vector<1x128x128xf32> to vector<128x128xf32>
    %cst_37 = arith.constant dense<0.000000e+00> : vector<8x128xf32>
    %74 = tpu.matmul %71, %73, %cst_37 {dimension_numbers = #tpu.dot_dimension_numbers<[1], [0], [0], [1], [0, 0, 1, 1], [], []>} : vector<8x128xf32>, vector<128x128xf32>, vector<8x128xf32> -> vector<8x128xf32>
    %75 = vector.extract_strided_slice %0 {offsets = [7, 0], sizes = [1, 128], strides = [1, 1]} : vector<8x128xf32> to vector<1x128xf32>
    %76 = vector.broadcast %75 : vector<1x128xf32> to vector<8x128xf32>
    %77 = arith.addf %74, %76 : vector<8x128xf32>
    %78 = tpu.iota {dimensions = array<i32: 1>} : vector<8x128xi32>
    %c4_i32 = arith.constant 4 : i32
    %79 = vector.broadcast %c4_i32 : i32 to vector<8x128xi32>
    %80 = arith.cmpi slt, %78, %79 : vector<8x128xi32>
    %cst_38 = arith.constant -1.000000e+30 : f32
    %81 = vector.broadcast %cst_38 : f32 to vector<8x128xf32>
    %82 = arith.select %80, %77, %81 : vector<8x128xi1>, vector<8x128xf32>
    %cst_39 = arith.constant dense<0xFF800000> : vector<8xf32>
    %83 = vector.multi_reduction <maximumf>, %82, %cst_39 [1] : vector<8x128xf32> to vector<8xf32>
    %84 = vector.shape_cast %83 : vector<8xf32> to vector<8x1xf32>
    %85 = vector.broadcast %84 : vector<8x1xf32> to vector<8x128xf32>
    %86 = arith.subf %82, %85 : vector<8x128xf32>
    %87 = math.exp %86 : vector<8x128xf32>
    %cst_40 = arith.constant dense<0.000000e+00> : vector<8xf32>
    %88 = vector.multi_reduction <add>, %87, %cst_40 [1] : vector<8x128xf32> to vector<8xf32>
    %89 = vector.shape_cast %88 : vector<8xf32> to vector<8x1xf32>
    %90 = vector.broadcast %89 : vector<8x1xf32> to vector<8x128xf32>
    %91 = arith.divf %87, %90 : vector<8x128xf32>
    %c0_41 = arith.constant 0 : index
    %c0_42 = arith.constant 0 : index
    %92 = vector.load %arg3[%c0_41, %c0_42] : memref<8x512xf32, #tpu.memory_space<vmem>>, vector<8x128xf32>
    tpu.vector_store %arg3[%c0_41, %c0_42], %16 {strides = array<i32>} : memref<8x512xf32, #tpu.memory_space<vmem>>, vector<8x128xf32>,
    %c0_43 = arith.constant 0 : index
    %c128_44 = arith.constant 128 : index
    %93 = vector.load %arg3[%c0_43, %c128_44] : memref<8x512xf32, #tpu.memory_space<vmem>>, vector<8x128xf32>
    tpu.vector_store %arg3[%c0_43, %c128_44], %22 {strides = array<i32>} : memref<8x512xf32, #tpu.memory_space<vmem>>, vector<8x128xf32>,
    %c0_45 = arith.constant 0 : index
    %c256 = arith.constant 256 : index
    %94 = vector.load %arg3[%c0_45, %c256] : memref<8x512xf32, #tpu.memory_space<vmem>>, vector<8x128xf32>
    tpu.vector_store %arg3[%c0_45, %c256], %55 {strides = array<i32>} : memref<8x512xf32, #tpu.memory_space<vmem>>, vector<8x128xf32>,
    %c0_46 = arith.constant 0 : index
    %c384 = arith.constant 384 : index
    %95 = vector.load %arg3[%c0_46, %c384] : memref<8x512xf32, #tpu.memory_space<vmem>>, vector<8x128xf32>
    tpu.vector_store %arg3[%c0_46, %c384], %91 {strides = array<i32>} : memref<8x512xf32, #tpu.memory_space<vmem>>, vector<8x128xf32>,
    return
  }
}

</mosaic_0001>

<bundles_post_ra>
// kernel: tpu_custom_call.1
= control target key start
LH: loop header
LB: loop body
LE: loop exit
PB: predicated region body
PF: predicated region fallthrough
CT: control target
= control target key end

     0   :  { %8 = vsyncpa [#allocation3], 0  ;;  %s1560_s0 = inlined_call_operand.hbm [shape: f32[8,256], index: 0, kind: input, shape index: {}]   ;;  %s1561_s1 = inlined_call_operand.hbm [shape: f32[8,128,128], index: 1, kind: input, shape index: {}]   ;;  %s1562_s2 = inlined_call_operand.hbm [shape: f32[8,128], index: 2, kind: input, shape index: {}]   ;;  %s1563_s3 = inlined_call_operand.hbm [shape: f32[8,512], index: 3, kind: output, shape index: {}]  }
   0x1   :  { %9 = vsyncpa [#allocation6], 0 }
   0x2   :  { %10 = vsyncpa [#allocation4], 0  ;;  %s1354_s12 = smov [#allocation5]  }
   0x3   :  { %s26_s13 = sshll.u32 %s1354_s12, 4  ;;  %s27_s13 = int_to_ptr.vmem [resolvable:$true] %s26_s13 }
   0x4   :  { %s1276_s14 = scalar_lea.vmem %s27_s13, 16384  ;;  %p1281_p1 = scmp.lt.s32.totalorder %s27_s13, %s27_s13 }
   0x5   :  { %p1277_p0 = scmp.ne.s32.totalorder %s27_s13, %s1276_s14  ;;  %p1282_p2 = scmp.lt.s32.totalorder %s1276_s14, %s1276_s14 }
   0x7   :  { %p1283_p3 = por %p1282_p2, %p1281_p1 }
   0x9   :  { %p1284_p4 = pnand %p1283_p3, %p1277_p0 }
   0xb   :  { %1287 = shalt.err (!%p1284_p4)
}
   0xc   :  { %s1355_s15 = smov 128   ;;  %s1356_s16 = smov 8  }
   0xd   :  { %32 = dma.hbm_to_vmem [thread:$0]  %s1561_s1, 16384, %s27_s13, [#allocation6], %s1355_s15, %s1355_s15, %s1356_s16  }
   0xe   :  { %s1357_s19 = smov [#allocation2]   ;;  %s1358_s21 = smov [#allocation7]  }
   0xf   :  { %s17_s20 = sshll.u32 %s1357_s19, 4  ;;  %s39_s22 = sshll.u32 %s1358_s21, 4  ;;  %s18_s20 = int_to_ptr.vmem [resolvable:$true] %s17_s20  ;;  %s40_s22 = int_to_ptr.vmem [resolvable:$true] %s39_s22 }
  0x10   :  { %s1296_s23 = scalar_lea.vmem %s18_s20, 256  ;;  %p1301_p6 = scmp.lt.s32.totalorder %s18_s20, %s18_s20 }
  0x11   :  { %p1297_p5 = scmp.ne.s32.totalorder %s18_s20, %s1296_s23  ;;  %p1302_p7 = scmp.lt.s32.totalorder %s1296_s23, %s1296_s23 }
  0x13   :  { %p1303_p8 = por %p1302_p7, %p1301_p6 }
  0x15   :  { %p1304_p9 = pnand %p1303_p8, %p1297_p5 }
  0x17   :  { %1307 = shalt.err (!%p1304_p9)
}
  0x18   :  { %20 = dma.hbm_to_vmem [thread:$0]  %s1560_s0, 256, %s18_s20, [#allocation3]  }
  0x19   :  { %s1316_s26 = scalar_lea.vmem %s40_s22, 128  ;;  %p1321_p11 = scmp.lt.s32.totalorder %s40_s22, %s40_s22 }
  0x1a   :  { %p1317_p10 = scmp.ne.s32.totalorder %s40_s22, %s1316_s26  ;;  %p1322_p12 = scmp.lt.s32.totalorder %s1316_s26, %s1316_s26 }
  0x1c   :  { %p1323_p13 = por %p1322_p12, %p1321_p11 }
  0x1e   :  { %p1324_p0 = pnand %p1323_p13, %p1317_p10 }
  0x20   :  { %1327 = shalt.err (!%p1324_p0)
}
  0x21   :  { %42 = dma.hbm_to_vmem [thread:$0]  %s1562_s2, 128, %s40_s22, [#allocation6]  }
  0x22   :  { %1348 = dma.done.wait [#allocation3], 256  }
  0x23   :  { %1349 = vsyncadd [#allocation3], 4294967040 }
  0x24   :  { %1350 = dma.done.wait [#allocation6], 16512  }
  0x25   :  { %1351 = vsyncadd [#allocation6], 4294950784  ;;  %v1359_v0 = vmov 0.0   ;;  %vm1360_vm0 = vmmov 0   ;;  %v70_v1 = vld [vmem:[#allocation5 + $0x78] sm:$0xff]  ;;  %v69_v2 = vld [vmem:[#allocation5 + $0x70] sm:$0xff]  ;;  %v71_v50 = vlaneseq }
  0x26   :  { %970 = vmatprep.subr.mxu0 %v1359_v0  ;;  %1002 = vmatprep.mubr.msk.f32.mxu0 %vm1360_vm0, %v1359_v0  ;;  %v68_v3 = vld [vmem:[#allocation5 + $0x68] sm:$0xff]  ;;  %v67_v4 = vld [vmem:[#allocation5 + $0x60] sm:$0xff]  ;;  %v162_v5 = vld [vmem:[#allocation5 + $0xf8] sm:$0xff]  ;;  %s1361_s0 = smov [#allocation8]  }
  0x27   :  { %1005 = vmatprep.subr.mxu1 %v1359_v0  ;;  %1037 = vmatprep.mubr.msk.f32.mxu1 %vm1360_vm0, %v1359_v0  ;;  %v66_v6 = vld [vmem:[#allocation5 + $0x58] sm:$0xff]  ;;  %v161_v7 = vld [vmem:[#allocation5 + $0xf0] sm:$0xff]  ;;  %v160_v8 = vld [vmem:[#allocation5 + $0xe8] sm:$0xff]  ;;  %v1448_v51 = vshrl.u32 %v71_v50, 7  ;;  %s824_s2 = sshll.u32 %s1361_s0, 4  ;;  %s825_s2 = int_to_ptr.vmem [resolvable:$true] %s824_s2 }
  0x28   :  { %971 = vmatpush3.msra.mxu0 %v70_v1  ;;  %1006 = vmatpush3.msra.mxu1 %v162_v5  ;;  %v65_v9 = vld [vmem:[#allocation5 + $0x50] sm:$0xff]  ;;  %v159_v10 = vld [vmem:[#allocation5 + $0xe0] sm:$0xff]  ;;  %v64_v11 = vld [vmem:[#allocation5 + $0x48] sm:$0xff]  ;;  %s1328_s28 = scalar_lea.vmem %s825_s2, 512  ;;  %p1333_p2 = scmp.lt.s32.totalorder %s825_s2, %s825_s2 }
  0x29   :  { %972 = vmatprep.subr.mxu0 %v1359_v0  ;;  %1007 = vmatprep.subr.mxu1 %v1359_v0  ;;  %v158_v12 = vld [vmem:[#allocation5 + $0xd8] sm:$0xff]  ;;  %v63_v13 = vld [vmem:[#allocation5 + $0x40] sm:$0xff]  ;;  %v157_v14 = vld [vmem:[#allocation5 + $0xd0] sm:$0xff]  ;;  %v73_v52 = vsub.s32 0, %v1448_v51  ;;  %p1329_p1 = scmp.ne.s32.totalorder %s825_s2, %s1328_s28  ;;  %p1334_p3 = scmp.lt.s32.totalorder %s1328_s28, %s1328_s28 }
  0x2a   :  { %973 = vmatpush3.msra.mxu0 %v69_v2  ;;  %1008 = vmatpush3.msra.mxu1 %v161_v7  ;;  %v62_v15 = vld [vmem:[#allocation5 + $0x38] sm:$0xff]  ;;  %v156_v16 = vld [vmem:[#allocation5 + $0xc8] sm:$0xff]  ;;  %v61_v17 = vld [vmem:[#allocation5 + $0x30] sm:$0xff] }
  0x2b   :  { %974 = vmatprep.subr.mxu0 %v1359_v0  ;;  %1009 = vmatprep.subr.mxu1 %v1359_v0  ;;  %v155_v18 = vld [vmem:[#allocation5 + $0xc0] sm:$0xff]  ;;  %v60_v19 = vld [vmem:[#allocation5 + $0x28] sm:$0xff]  ;;  %v154_v20 = vld [vmem:[#allocation5 + $0xb8] sm:$0xff]  ;;  %p1335_p4 = por %p1334_p3, %p1333_p2 }
  0x2c   :  { %975 = vmatpush3.msra.mxu0 %v68_v3  ;;  %1010 = vmatpush3.msra.mxu1 %v160_v8  ;;  %v59_v21 = vld [vmem:[#allocation5 + $0x20] sm:$0xff]  ;;  %v153_v22 = vld [vmem:[#allocation5 + $0xb0] sm:$0xff]  ;;  %v58_v23 = vld [vmem:[#allocation5 + $0x18] sm:$0xff] }
  0x2d   :  { %976 = vmatprep.subr.mxu0 %v1359_v0  ;;  %1011 = vmatprep.subr.mxu1 %v1359_v0  ;;  %v152_v24 = vld [vmem:[#allocation5 + $0xa8] sm:$0xff]  ;;  %v57_v25 = vld [vmem:[#allocation5 + $0x10] sm:$0xff]  ;;  %v151_v26 = vld [vmem:[#allocation5 + $0xa0] sm:$0xff]  ;;  %p1336_p5 = pnand %p1335_p4, %p1329_p1 }
  0x2e   :  { %977 = vmatpush3.msra.mxu0 %v67_v4  ;;  %1012 = vmatpush3.msra.mxu1 %v159_v10  ;;  %v56_v27 = vld [vmem:[#allocation5 + $0x8] sm:$0xff]  ;;  %v150_v28 = vld [vmem:[#allocation5 + $0x98] sm:$0xff]  ;;  %v55_v29 = vld [vmem:[#allocation5] sm:$0xff] }
  0x2f   :  { %978 = vmatprep.subr.mxu0 %v1359_v0  ;;  %1013 = vmatprep.subr.mxu1 %v1359_v0  ;;  %v53_v30 = vld [vmem:[#allocation2] sm:$0xff]  ;;  %v253_v31 = vld [vmem:[#allocation5 + $0x178] sm:$0xff]  ;;  %v251_v33 = vld [vmem:[#allocation5 + $0x168] sm:$0xff] }
  0x30   :  { %979 = vmatpush3.msra.mxu0 %v66_v6  ;;  %1014 = vmatpush3.msra.mxu1 %v158_v12  ;;  %v252_v32 = vld [vmem:[#allocation5 + $0x170] sm:$0xff]  ;;  %v250_v34 = vld [vmem:[#allocation5 + $0x160] sm:$0xff]  ;;  %v249_v35 = vld [vmem:[#allocation5 + $0x158] sm:$0xff] }
  0x31   :  { %980 = vmatprep.subr.mxu0 %v1359_v0  ;;  %1015 = vmatprep.subr.mxu1 %v1359_v0  ;;  %v248_v36 = vld [vmem:[#allocation5 + $0x150] sm:$0xff]  ;;  %v247_v37 = vld [vmem:[#allocation5 + $0x148] sm:$0xff]  ;;  %v246_v38 = vld [vmem:[#allocation5 + $0x140] sm:$0xff] }
  0x32   :  { %981 = vmatpush3.msra.mxu0 %v65_v9  ;;  %1016 = vmatpush3.msra.mxu1 %v157_v14  ;;  %v245_v39 = vld [vmem:[#allocation5 + $0x138] sm:$0xff]  ;;  %v244_v40 = vld [vmem:[#allocation5 + $0x130] sm:$0xff]  ;;  %v243_v41 = vld [vmem:[#allocation5 + $0x128] sm:$0xff] }
  0x33   :  { %982 = vmatprep.subr.mxu0 %v1359_v0  ;;  %1017 = vmatprep.subr.mxu1 %v1359_v0  ;;  %v242_v42 = vld [vmem:[#allocation5 + $0x120] sm:$0xff]  ;;  %v241_v43 = vld [vmem:[#allocation5 + $0x118] sm:$0xff]  ;;  %v149_v44 = vld [vmem:[#allocation5 + $0x90] sm:$0xff] }
  0x34   :  { %983 = vmatpush3.msra.mxu0 %v64_v11  ;;  %1018 = vmatpush3.msra.mxu1 %v156_v16  ;;  %v240_v45 = vld [vmem:[#allocation5 + $0x110] sm:$0xff]  ;;  %v148_v46 = vld [vmem:[#allocation5 + $0x88] sm:$0xff]  ;;  %v147_v48 = vld [vmem:[#allocation5 + $0x80] sm:$0xff] }
  0x35   :  { %984 = vmatprep.subr.mxu0 %v1359_v0  ;;  %1019 = vmatprep.subr.mxu1 %v1359_v0  ;;  %v239_v47 = vld [vmem:[#allocation5 + $0x108] sm:$0xff]  ;;  %v238_v49 = vld [vmem:[#allocation5 + $0x100] sm:$0xff]  ;;  %v349_v59 = vld [vmem:[#allocation5 + $0x1f8] sm:$0xff] }
  0x36   :  { %985 = vmatpush3.msra.mxu0 %v63_v13  ;;  %1020 = vmatpush3.msra.mxu1 %v155_v18  ;;  %v1451_v53 = vld [vmem:[#allocation7] sm:$0xff]  ;;  %v348_v60 = vld [vmem:[#allocation5 + $0x1f0] sm:$0xff]  ;;  %v347_v61 = vld [vmem:[#allocation5 + $0x1e8] sm:$0xff] }
  0x37   :  { %986 = vmatprep.subr.mxu0 %v1359_v0  ;;  %1021 = vmatprep.subr.mxu1 %v1359_v0  ;;  %v74_v54 = vrot.slane %v1451_v53, %v73_v52  ;;  %v346_v62 = vld [vmem:[#allocation5 + $0x1e0] sm:$0xff]  ;;  %v345_v63 = vld [vmem:[#allocation5 + $0x1d8] sm:$0xff]  ;;  %v344_v1 = vld [vmem:[#allocation5 + $0x1d0] sm:$0xff] }
  0x38   :  { %987 = vmatpush3.msra.mxu0 %v62_v15  ;;  %1022 = vmatpush3.msra.mxu1 %v154_v20  ;;  %v343_v2 = vld [vmem:[#allocation5 + $0x1c8] sm:$0xff]  ;;  %v342_v3 = vld [vmem:[#allocation5 + $0x1c0] sm:$0xff]  ;;  %v341_v4 = vld [vmem:[#allocation5 + $0x1b8] sm:$0xff] }
  0x39   :  { %988 = vmatprep.subr.mxu0 %v1359_v0  ;;  %1023 = vmatprep.subr.mxu1 %v1359_v0  ;;  %v340_v5 = vld [vmem:[#allocation5 + $0x1b0] sm:$0xff]  ;;  %v339_v6 = vld [vmem:[#allocation5 + $0x1a8] sm:$0xff]  ;;  %v338_v7 = vld [vmem:[#allocation5 + $0x1a0] sm:$0xff] }
  0x3a   :  { %989 = vmatpush3.msra.mxu0 %v61_v17  ;;  %1024 = vmatpush3.msra.mxu1 %v153_v22  ;;  %v337_v8 = vld [vmem:[#allocation5 + $0x198] sm:$0xff]  ;;  %v336_v9 = vld [vmem:[#allocation5 + $0x190] sm:$0xff]  ;;  %v335_v10 = vld [vmem:[#allocation5 + $0x188] sm:$0xff] }
  0x3b   :  { %990 = vmatprep.subr.mxu0 %v1359_v0  ;;  %1025 = vmatprep.subr.mxu1 %v1359_v0  ;;  %v334_v11 = vld [vmem:[#allocation5 + $0x180] sm:$0xff]  ;;  %v441_v12 = vld [vmem:[#allocation5 + $0x278] sm:$0xff]  ;;  %v440_v13 = vld [vmem:[#allocation5 + $0x270] sm:$0xff] }
  0x3c   :  { %991 = vmatpush3.msra.mxu0 %v60_v19  ;;  %1026 = vmatpush3.msra.mxu1 %v152_v24  ;;  %v439_v14 = vld [vmem:[#allocation5 + $0x268] sm:$0xff]  ;;  %v438_v15 = vld [vmem:[#allocation5 + $0x260] sm:$0xff]  ;;  %v437_v16 = vld [vmem:[#allocation5 + $0x258] sm:$0xff] }
  0x3d   :  { %992 = vmatprep.subr.mxu0 %v1359_v0  ;;  %1027 = vmatprep.subr.mxu1 %v1359_v0  ;;  %v436_v17 = vld [vmem:[#allocation5 + $0x250] sm:$0xff]  ;;  %v435_v18 = vld [vmem:[#allocation5 + $0x248] sm:$0xff]  ;;  %v434_v19 = vld [vmem:[#allocation5 + $0x240] sm:$0xff] }
  0x3e   :  { %993 = vmatpush3.msra.mxu0 %v59_v21  ;;  %1028 = vmatpush3.msra.mxu1 %v151_v26  ;;  %v433_v20 = vld [vmem:[#allocation5 + $0x238] sm:$0xff]  ;;  %v432_v21 = vld [vmem:[#allocation5 + $0x230] sm:$0xff]  ;;  %v431_v22 = vld [vmem:[#allocation5 + $0x228] sm:$0xff]  ;;  %v165_v26 = vsub.s32 1, %v1448_v51 }
  0x3f   :  { %994 = vmatprep.subr.mxu0 %v1359_v0  ;;  %1029 = vmatprep.subr.mxu1 %v1359_v0  ;;  %v429_v24 = vld [vmem:[#allocation5 + $0x218] sm:$0xff] }
  0x40   :  { %995 = vmatpush3.msra.mxu0 %v58_v23  ;;  %1030 = vmatpush3.msra.mxu1 %v150_v28  ;;  %v430_v23 = vld [vmem:[#allocation5 + $0x220] sm:$0xff]  ;;  %v166_v28 = vrot.slane %v1451_v53, %v165_v26  ;;  %v534_v52 = vld [vmem:[#allocation5 + $0x2b8] sm:$0xff] }
  0x41   :  { %996 = vmatprep.subr.mxu0 %v1359_v0  ;;  %1031 = vmatprep.subr.mxu1 %v1359_v0 }
  0x42   :  { %997 = vmatpush3.msra.mxu0 %v57_v25  ;;  %1032 = vmatpush3.msra.mxu1 %v149_v44  ;;  %v428_v25 = vld [vmem:[#allocation5 + $0x210] sm:$0xff]  ;;  %v540_v44 = vld [vmem:[#allocation5 + $0x2e8] sm:$0xff] }
  0x43   :  { %998 = vmatprep.subr.mxu0 %v1359_v0  ;;  %1033 = vmatprep.subr.mxu1 %v1359_v0 }
  0x44   :  { %999 = vmatpush3.msra.mxu0 %v56_v27  ;;  %1034 = vmatpush3.msra.mxu1 %v148_v46  ;;  %v256_v27 = vsub.s32 2, %v1448_v51  ;;  %v538_v46 = vld [vmem:[#allocation5 + $0x2d8] sm:$0xff] }
  0x45   :  { %1000 = vmatprep.subr.mxu0 %v1359_v0  ;;  %1035 = vmatprep.subr.mxu1 %v1359_v0 }
  0x46   :  { %1001 = vmatpush3.msra.mxu0 %v55_v29  ;;  %1036 = vmatpush3.msra.mxu1 %v147_v48  ;;  %v257_v29 = vrot.slane %v1451_v53, %v256_v27  ;;  %v536_v48 = vld [vmem:[#allocation5 + $0x2c8] sm:$0xff] }
  0x47   :  { %1003 = vmatmul.mubr.f32.vlgmr.msra.gmra.mxu0 %v53_v30  ;;  %1040 = vmatprep.subr.mxu0 %v1359_v0 }
  0x48   :  { %1041 = vmatpush3.msra.mxu0 %v253_v31  ;;  %1072 = vmatprep.mubr.msk.f32.mxu0 %vm1360_vm0, %v1359_v0 }
  0x49   :  { %1042 = vmatprep.subr.mxu0 %v1359_v0  ;;  %1075 = vmatprep.subr.mxu1 %v1359_v0 }
  0x4a   :  { %1043 = vmatpush3.msra.mxu0 %v252_v32 }
  0x4b   :  { %1044 = vmatprep.subr.mxu0 %v1359_v0 }
  0x4c   :  { %1045 = vmatpush3.msra.mxu0 %v251_v33 }
  0x4d   :  { %1046 = vmatprep.subr.mxu0 %v1359_v0 }
  0x4e   :  { %1047 = vmatpush3.msra.mxu0 %v250_v34 }
  0x4f   :  { %1048 = vmatprep.subr.mxu0 %v1359_v0 }
  0x50   :  { %1049 = vmatpush3.msra.mxu0 %v249_v35 }
  0x51   :  { %1050 = vmatprep.subr.mxu0 %v1359_v0 }
  0x52   :  { %1051 = vmatpush3.msra.mxu0 %v248_v36 }
  0x53   :  { %1052 = vmatprep.subr.mxu0 %v1359_v0 }
  0x54   :  { %1053 = vmatpush3.msra.mxu0 %v247_v37 }
  0x55   :  { %1054 = vmatprep.subr.mxu0 %v1359_v0 }
  0x56   :  { %1055 = vmatpush3.msra.mxu0 %v246_v38  ;;  %v54_v38 = vld [vmem:[#allocation2 + $0x8] sm:$0xff] }
  0x57   :  { %1056 = vmatprep.subr.mxu0 %v1359_v0 }
  0x58   :  { %1057 = vmatpush3.msra.mxu0 %v245_v39 }
  0x59   :  { %1058 = vmatprep.subr.mxu0 %v1359_v0 }
  0x5a   :  { %1059 = vmatpush3.msra.mxu0 %v244_v40 }
  0x5b   :  { %1060 = vmatprep.subr.mxu0 %v1359_v0 }
  0x5c   :  { %1061 = vmatpush3.msra.mxu0 %v243_v41 }
  0x5d   :  { %1062 = vmatprep.subr.mxu0 %v1359_v0 }
  0x5e   :  { %1063 = vmatpush3.msra.mxu0 %v242_v42  ;;  %v542_v42 = vld [vmem:[#allocation5 + $0x2f8] sm:$0xff] }
  0x5f   :  { %1064 = vmatprep.subr.mxu0 %v1359_v0 }
  0x60   :  { %1065 = vmatpush3.msra.mxu0 %v241_v43  ;;  %v541_v43 = vld [vmem:[#allocation5 + $0x2f0] sm:$0xff] }
  0x61   :  { %1066 = vmatprep.subr.mxu0 %v1359_v0 }
  0x62   :  { %1067 = vmatpush3.msra.mxu0 %v240_v45  ;;  %v539_v45 = vld [vmem:[#allocation5 + $0x2e0] sm:$0xff] }
  0x63   :  { %1068 = vmatprep.subr.mxu0 %v1359_v0 }
  0x64   :  { %1069 = vmatpush3.msra.mxu0 %v239_v47  ;;  %v537_v47 = vld [vmem:[#allocation5 + $0x2d0] sm:$0xff] }
  0x65   :  { %1070 = vmatprep.subr.mxu0 %v1359_v0 }
  0x66   :  { %1071 = vmatpush3.msra.mxu0 %v238_v49  ;;  %v535_v49 = vld [vmem:[#allocation5 + $0x2c0] sm:$0xff] }
  0x67   :  { %1110 = vmatprep.subr.mxu0 %v1359_v0 }
 0x107   :  { %v141_v55 = vpop.f32.mrf.mxu0 }
 0x108   :  { %v142_v56 = vadd.f32 %v141_v55, %v74_v54  ;;  %v533_v54 = vld [vmem:[#allocation5 + $0x2b0] sm:$0xff]  ;;  %v532_v55 = vld [vmem:[#allocation5 + $0x2a8] sm:$0xff] }
 0x109   :  { %v1004_v57 = vpop.f32.mrf.mxu0 }
 0x10a   :  { %v145_v58 = vmax.f32 %v142_v56, 0.0  ;;  %v531_v56 = vld [vmem:[#allocation5 + $0x2a0] sm:$0xff]  ;;  %v530_v57 = vld [vmem:[#allocation5 + $0x298] sm:$0xff] }
 0x10c   :  { %1038 = vmatmul.mubr.f32.vlgmr.msra.gmra.mxu1 %v145_v58  ;;  %1073 = vmatmul.mubr.f32.vlgmr.msra.gmra.mxu0 %v145_v58  ;;  %v529_v58 = vld [vmem:[#allocation5 + $0x290] sm:$0xff] }
 0x10d   :  { %1076 = vmatpush3.msra.mxu1 %v349_v59  ;;  %1107 = vmatprep.mubr.msk.f32.mxu1 %vm1360_vm0, %v1359_v0  ;;  %v528_v59 = vld [vmem:[#allocation5 + $0x288] sm:$0xff] }
 0x10e   :  { %1077 = vmatprep.subr.mxu1 %v1359_v0  ;;  %1142 = vmatprep.mubr.msk.f32.mxu0 %vm1360_vm0, %v1359_v0 }
 0x10f   :  { %1078 = vmatpush3.msra.mxu1 %v348_v60  ;;  %1111 = vmatpush3.msra.mxu0 %v441_v12  ;;  %v527_v60 = vld [vmem:[#allocation5 + $0x280] sm:$0xff]  ;;  %v628_v12 = vld [vmem:[#allocation5 + $0x348] sm:$0xff] }
 0x110   :  { %1079 = vmatprep.subr.mxu1 %v1359_v0  ;;  %1112 = vmatprep.subr.mxu0 %v1359_v0 }
 0x111   :  { %1080 = vmatpush3.msra.mxu1 %v347_v61  ;;  %1113 = vmatpush3.msra.mxu0 %v440_v13  ;;  %v427_v61 = vld [vmem:[#allocation5 + $0x208] sm:$0xff]  ;;  %v627_v13 = vld [vmem:[#allocation5 + $0x340] sm:$0xff] }
 0x112   :  { %1081 = vmatprep.subr.mxu1 %v1359_v0  ;;  %1114 = vmatprep.subr.mxu0 %v1359_v0 }
 0x113   :  { %1082 = vmatpush3.msra.mxu1 %v346_v62  ;;  %1115 = vmatpush3.msra.mxu0 %v439_v14  ;;  %v426_v62 = vld [vmem:[#allocation5 + $0x200] sm:$0xff]  ;;  %v626_v14 = vld [vmem:[#allocation5 + $0x338] sm:$0xff] }
 0x114   :  { %1083 = vmatprep.subr.mxu1 %v1359_v0  ;;  %1116 = vmatprep.subr.mxu0 %v1359_v0 }
 0x115   :  { %1084 = vmatpush3.msra.mxu1 %v345_v63  ;;  %1117 = vmatpush3.msra.mxu0 %v438_v15  ;;  %v352_v63 = vsub.s32 3, %v1448_v51  ;;  %v625_v15 = vld [vmem:[#allocation5 + $0x330] sm:$0xff] }
 0x116   :  { %1085 = vmatprep.subr.mxu1 %v1359_v0  ;;  %1118 = vmatprep.subr.mxu0 %v1359_v0 }
 0x117   :  { %1086 = vmatpush3.msra.mxu1 %v344_v1  ;;  %1119 = vmatpush3.msra.mxu0 %v437_v16  ;;  %v353_v1 = vrot.slane %v1451_v53, %v352_v63  ;;  %v624_v16 = vld [vmem:[#allocation5 + $0x328] sm:$0xff] }
 0x118   :  { %1087 = vmatprep.subr.mxu1 %v1359_v0  ;;  %1120 = vmatprep.subr.mxu0 %v1359_v0 }
 0x119   :  { %1088 = vmatpush3.msra.mxu1 %v343_v2  ;;  %1121 = vmatpush3.msra.mxu0 %v436_v17  ;;  %v623_v17 = vld [vmem:[#allocation5 + $0x320] sm:$0xff] }
 0x11a   :  { %1089 = vmatprep.subr.mxu1 %v1359_v0  ;;  %1122 = vmatprep.subr.mxu0 %v1359_v0 }
 0x11b   :  { %1090 = vmatpush3.msra.mxu1 %v342_v3  ;;  %1123 = vmatpush3.msra.mxu0 %v435_v18  ;;  %v545_v18 = vsub.s32 5, %v1448_v51 }
 0x11c   :  { %1091 = vmatprep.subr.mxu1 %v1359_v0  ;;  %1124 = vmatprep.subr.mxu0 %v1359_v0 }
 0x11d   :  { %1092 = vmatpush3.msra.mxu1 %v341_v4  ;;  %1125 = vmatpush3.msra.mxu0 %v434_v19  ;;  %v622_v19 = vld [vmem:[#allocation5 + $0x318] sm:$0xff] }
 0x11e   :  { %1093 = vmatprep.subr.mxu1 %v1359_v0  ;;  %1126 = vmatprep.subr.mxu0 %v1359_v0 }
 0x11f   :  { %1094 = vmatpush3.msra.mxu1 %v340_v5  ;;  %1127 = vmatpush3.msra.mxu0 %v433_v20  ;;  %v546_v20 = vrot.slane %v1451_v53, %v545_v18 }
 0x120   :  { %1095 = vmatprep.subr.mxu1 %v1359_v0  ;;  %1128 = vmatprep.subr.mxu0 %v1359_v0 }
 0x121   :  { %1096 = vmatpush3.msra.mxu1 %v339_v6  ;;  %1129 = vmatpush3.msra.mxu0 %v432_v21  ;;  %v634_v6 = vld [vmem:[#allocation5 + $0x378] sm:$0xff]  ;;  %v621_v21 = vld [vmem:[#allocation5 + $0x310] sm:$0xff] }
 0x122   :  { %1097 = vmatprep.subr.mxu1 %v1359_v0  ;;  %1130 = vmatprep.subr.mxu0 %v1359_v0 }
 0x123   :  { %1098 = vmatpush3.msra.mxu1 %v338_v7  ;;  %1131 = vmatpush3.msra.mxu0 %v431_v22  ;;  %v633_v7 = vld [vmem:[#allocation5 + $0x370] sm:$0xff]  ;;  %v620_v22 = vld [vmem:[#allocation5 + $0x308] sm:$0xff] }
 0x124   :  { %1099 = vmatprep.subr.mxu1 %v1359_v0  ;;  %1132 = vmatprep.subr.mxu0 %v1359_v0 }
 0x125   :  { %1100 = vmatpush3.msra.mxu1 %v337_v8  ;;  %1133 = vmatpush3.msra.mxu0 %v430_v23  ;;  %v632_v8 = vld [vmem:[#allocation5 + $0x368] sm:$0xff] }
 0x126   :  { %1101 = vmatprep.subr.mxu1 %v1359_v0  ;;  %1134 = vmatprep.subr.mxu0 %v1359_v0 }
 0x127   :  { %1102 = vmatpush3.msra.mxu1 %v336_v9  ;;  %1135 = vmatpush3.msra.mxu0 %v429_v24  ;;  %v631_v9 = vld [vmem:[#allocation5 + $0x360] sm:$0xff] }
 0x128   :  { %1103 = vmatprep.subr.mxu1 %v1359_v0  ;;  %1136 = vmatprep.subr.mxu0 %v1359_v0 }
 0x129   :  { %1104 = vmatpush3.msra.mxu1 %v335_v10  ;;  %1137 = vmatpush3.msra.mxu0 %v428_v25  ;;  %v630_v10 = vld [vmem:[#allocation5 + $0x358] sm:$0xff]  ;;  %v619_v25 = vld [vmem:[#allocation5 + $0x300] sm:$0xff] }
 0x12a   :  { %1105 = vmatprep.subr.mxu1 %v1359_v0  ;;  %1138 = vmatprep.subr.mxu0 %v1359_v0 }
 0x12b   :  { %1106 = vmatpush3.msra.mxu1 %v334_v11  ;;  %1139 = vmatpush3.msra.mxu0 %v427_v61  ;;  %v629_v11 = vld [vmem:[#allocation5 + $0x350] sm:$0xff] }
 0x12c   :  { %1145 = vmatprep.subr.mxu1 %v1359_v0  ;;  %1140 = vmatprep.subr.mxu0 %v1359_v0 }
 0x12d   :  { %1141 = vmatpush3.msra.mxu0 %v426_v62 }
 0x12e   :  { %1180 = vmatprep.subr.mxu0 %v1359_v0 }
 0x1cc   :  { %v233_v30 = vpop.f32.mrf.mxu1  ;;  %v324_v31 = vpop.f32.mrf.mxu0 }
 0x1cd   :  { %v234_v32 = vadd.f32 %v233_v30, %v166_v28  ;;  %v325_v33 = vadd.f32 %v324_v31, %v257_v29  ;;  %v726_v28 = vld [vmem:[#allocation5 + $0x3f8] sm:$0xff]  ;;  %v725_v29 = vld [vmem:[#allocation5 + $0x3f0] sm:$0xff]  ;;  %v724_v30 = vld [vmem:[#allocation5 + $0x3e8] sm:$0xff] }
 0x1ce   :  { %v1039_v34 = vpop.f32.mrf.mxu1  ;;  %v1074_v35 = vpop.f32.mrf.mxu0  ;;  %v723_v31 = vld [vmem:[#allocation5 + $0x3e0] sm:$0xff] }
 0x1cf   :  { %814 = vst [vmem:[#allocation8] sm:$0xff] %v234_v32  ;;  %v328_v36 = vmul.f32 0.5, %v325_v33  ;;  %815 = vst [vmem:[#allocation8 + $0x8] sm:$0xff] %v325_v33  ;;  %v721_v33 = vld [vmem:[#allocation5 + $0x3d0] sm:$0xff]  ;;  %v720_v34 = vld [vmem:[#allocation5 + $0x3c8] sm:$0xff] }
 0x1d0   :  { %v719_v35 = vld [vmem:[#allocation5 + $0x3c0] sm:$0xff] }
 0x1d1   :  { %v329_v37 = vmul.f32 1.442695, %v328_v36  ;;  %v718_v36 = vld [vmem:[#allocation5 + $0x3b8] sm:$0xff] }
 0x1d3   :  { %1258 = vpow2.f32 %v329_v37  ;;  %v717_v37 = vld [vmem:[#allocation5 + $0x3b0] sm:$0xff] }
 0x1e0   :  { %v1259_v39 = vpop.eup %1258 }
 0x1e1   :  { %v331_v40 = vmul.f32 %v1259_v39, %v54_v38  ;;  %v716_v38 = vld [vmem:[#allocation5 + $0x3a8] sm:$0xff]  ;;  %v715_v39 = vld [vmem:[#allocation5 + $0x3a0] sm:$0xff] }
 0x1e3   :  { %v332_v41 = vadd.f32 %v331_v40, %v234_v32  ;;  %v714_v40 = vld [vmem:[#allocation5 + $0x398] sm:$0xff] }
 0x1e5   :  { %1108 = vmatmul.mubr.f32.vlgmr.msra.gmra.mxu1 %v332_v41  ;;  %v713_v41 = vld [vmem:[#allocation5 + $0x390] sm:$0xff] }
 0x1e6   :  { %1146 = vmatpush3.msra.mxu1 %v542_v42  ;;  %1177 = vmatprep.mubr.msk.f32.mxu1 %vm1360_vm0, %v1359_v0  ;;  %v712_v42 = vld [vmem:[#allocation5 + $0x388] sm:$0xff] }
 0x1e7   :  { %1147 = vmatprep.subr.mxu1 %v1359_v0 }
 0x1e8   :  { %1148 = vmatpush3.msra.mxu1 %v541_v43  ;;  %v711_v43 = vld [vmem:[#allocation5 + $0x380] sm:$0xff] }
 0x1e9   :  { %1149 = vmatprep.subr.mxu1 %v1359_v0 }
 0x1ea   :  { %1150 = vmatpush3.msra.mxu1 %v540_v44  ;;  %v444_v44 = vsub.s32 4, %v1448_v51 }
 0x1eb   :  { %1151 = vmatprep.subr.mxu1 %v1359_v0 }
 0x1ec   :  { %1152 = vmatpush3.msra.mxu1 %v539_v45  ;;  %v445_v45 = vrot.slane %v1451_v53, %v444_v44 }
 0x1ed   :  { %1153 = vmatprep.subr.mxu1 %v1359_v0 }
 0x1ee   :  { %1154 = vmatpush3.msra.mxu1 %v538_v46 }
 0x1ef   :  { %1155 = vmatprep.subr.mxu1 %v1359_v0 }
 0x1f0   :  { %1156 = vmatpush3.msra.mxu1 %v537_v47 }
 0x1f1   :  { %1157 = vmatprep.subr.mxu1 %v1359_v0 }
 0x1f2   :  { %1158 = vmatpush3.msra.mxu1 %v536_v48 }
 0x1f3   :  { %1159 = vmatprep.subr.mxu1 %v1359_v0 }
 0x1f4   :  { %1160 = vmatpush3.msra.mxu1 %v535_v49 }
 0x1f5   :  { %1161 = vmatprep.subr.mxu1 %v1359_v0 }
 0x1f6   :  { %1162 = vmatpush3.msra.mxu1 %v534_v52 }
 0x1f7   :  { %1163 = vmatprep.subr.mxu1 %v1359_v0 }
 0x1f8   :  { %1164 = vmatpush3.msra.mxu1 %v533_v54 }
 0x1f9   :  { %1165 = vmatprep.subr.mxu1 %v1359_v0 }
 0x1fa   :  { %1166 = vmatpush3.msra.mxu1 %v532_v55 }
 0x1fb   :  { %1167 = vmatprep.subr.mxu1 %v1359_v0 }
 0x1fc   :  { %1168 = vmatpush3.msra.mxu1 %v531_v56 }
 0x1fd   :  { %1169 = vmatprep.subr.mxu1 %v1359_v0 }
 0x1fe   :  { %1170 = vmatpush3.msra.mxu1 %v530_v57  ;;  %v637_v57 = vsub.s32 6, %v1448_v51 }
 0x1ff   :  { %1171 = vmatprep.subr.mxu1 %v1359_v0 }
 0x200   :  { %1172 = vmatpush3.msra.mxu1 %v529_v58 }
 0x201   :  { %1173 = vmatprep.subr.mxu1 %v1359_v0 }
 0x202   :  { %1174 = vmatpush3.msra.mxu1 %v528_v59 }
 0x203   :  { %1175 = vmatprep.subr.mxu1 %v1359_v0 }
 0x204   :  { %1176 = vmatpush3.msra.mxu1 %v527_v60 }
 0x205   :  { %1178 = vmatmul.mubr.f32.vlgmr.msra.gmra.mxu1 %v234_v32  ;;  %1215 = vmatprep.subr.mxu1 %v1359_v0  ;;  %v722_v32 = vld [vmem:[#allocation5 + $0x3d8] sm:$0xff] }
 0x206   :  { %1247 = vmatprep.mubr.msk.f32.mxu1 %vm1360_vm0, %v1359_v0  ;;  %1216 = vmatpush3.msra.mxu1 %v726_v28 }
 0x207   :  { %1217 = vmatprep.subr.mxu1 %v1359_v0 }
 0x208   :  { %1218 = vmatpush3.msra.mxu1 %v725_v29 }
 0x209   :  { %1219 = vmatprep.subr.mxu1 %v1359_v0 }
 0x20a   :  { %1220 = vmatpush3.msra.mxu1 %v724_v30 }
 0x20b   :  { %1221 = vmatprep.subr.mxu1 %v1359_v0 }
 0x20c   :  { %1222 = vmatpush3.msra.mxu1 %v723_v31 }
 0x20d   :  { %1223 = vmatprep.subr.mxu1 %v1359_v0 }
 0x20e   :  { %1224 = vmatpush3.msra.mxu1 %v722_v32 }
 0x20f   :  { %1225 = vmatprep.subr.mxu1 %v1359_v0 }
 0x210   :  { %1226 = vmatpush3.msra.mxu1 %v721_v33 }
 0x211   :  { %1227 = vmatprep.subr.mxu1 %v1359_v0 }
 0x212   :  { %1228 = vmatpush3.msra.mxu1 %v720_v34 }
 0x213   :  { %1229 = vmatprep.subr.mxu1 %v1359_v0 }
 0x214   :  { %1230 = vmatpush3.msra.mxu1 %v719_v35 }
 0x215   :  { %1231 = vmatprep.subr.mxu1 %v1359_v0 }
 0x216   :  { %1232 = vmatpush3.msra.mxu1 %v718_v36 }
 0x217   :  { %1233 = vmatprep.subr.mxu1 %v1359_v0 }
 0x218   :  { %1234 = vmatpush3.msra.mxu1 %v717_v37 }
 0x219   :  { %1235 = vmatprep.subr.mxu1 %v1359_v0 }
 0x21a   :  { %1236 = vmatpush3.msra.mxu1 %v716_v38 }
 0x21b   :  { %1237 = vmatprep.subr.mxu1 %v1359_v0 }
 0x21c   :  { %1238 = vmatpush3.msra.mxu1 %v715_v39 }
 0x21d   :  { %1239 = vmatprep.subr.mxu1 %v1359_v0 }
 0x21e   :  { %1240 = vmatpush3.msra.mxu1 %v714_v40 }
 0x21f   :  { %1241 = vmatprep.subr.mxu1 %v1359_v0 }
 0x220   :  { %1242 = vmatpush3.msra.mxu1 %v713_v41 }
 0x221   :  { %1243 = vmatprep.subr.mxu1 %v1359_v0 }
 0x222   :  { %1244 = vmatpush3.msra.mxu1 %v712_v42 }
 0x223   :  { %1245 = vmatprep.subr.mxu1 %v1359_v0 }
 0x224   :  { %1246 = vmatpush3.msra.mxu1 %v711_v43 }
 0x2a5   :  { %v420_v2 = vpop.f32.mrf.mxu1 }
 0x2a6   :  { %v421_v3 = vadd.f32 %v420_v2, %v353_v1  ;;  %v729_v2 = vsub.s32 7, %v1448_v51 }
 0x2a7   :  { %v1109_v4 = vpop.f32.mrf.mxu1 }
 0x2a8   :  { %v424_v5 = vmax.f32 %v421_v3, 0.0  ;;  %v802_v3 = vand.u32 127, %v71_v50  ;;  %v730_v4 = vrot.slane %v1451_v53, %v729_v2 }
 0x2aa   :  { %1143 = vmatmul.mubr.f32.vlgmr.msra.gmra.mxu0 %v424_v5  ;;  %vm803_vm2 = vcmp.lt.s32.totalorder %v802_v3, 4 }
 0x2ab   :  { %1181 = vmatpush3.msra.mxu0 %v634_v6  ;;  %1212 = vmatprep.mubr.msk.f32.mxu0 %vm1360_vm0, %v1359_v0 }
 0x2ac   :  { %1182 = vmatprep.subr.mxu0 %v1359_v0 }
 0x2ad   :  { %1183 = vmatpush3.msra.mxu0 %v633_v7 }
 0x2ae   :  { %1184 = vmatprep.subr.mxu0 %v1359_v0 }
 0x2af   :  { %1185 = vmatpush3.msra.mxu0 %v632_v8 }
 0x2b0   :  { %1186 = vmatprep.subr.mxu0 %v1359_v0 }
 0x2b1   :  { %1187 = vmatpush3.msra.mxu0 %v631_v9 }
 0x2b2   :  { %1188 = vmatprep.subr.mxu0 %v1359_v0 }
 0x2b3   :  { %1189 = vmatpush3.msra.mxu0 %v630_v10 }
 0x2b4   :  { %1190 = vmatprep.subr.mxu0 %v1359_v0 }
 0x2b5   :  { %1191 = vmatpush3.msra.mxu0 %v629_v11 }
 0x2b6   :  { %1192 = vmatprep.subr.mxu0 %v1359_v0 }
 0x2b7   :  { %1193 = vmatpush3.msra.mxu0 %v628_v12 }
 0x2b8   :  { %1194 = vmatprep.subr.mxu0 %v1359_v0 }
 0x2b9   :  { %1195 = vmatpush3.msra.mxu0 %v627_v13 }
 0x2ba   :  { %1196 = vmatprep.subr.mxu0 %v1359_v0 }
 0x2bb   :  { %1197 = vmatpush3.msra.mxu0 %v626_v14 }
 0x2bc   :  { %1198 = vmatprep.subr.mxu0 %v1359_v0 }
 0x2bd   :  { %1199 = vmatpush3.msra.mxu0 %v625_v15 }
 0x2be   :  { %1200 = vmatprep.subr.mxu0 %v1359_v0 }
 0x2bf   :  { %1201 = vmatpush3.msra.mxu0 %v624_v16 }
 0x2c0   :  { %1202 = vmatprep.subr.mxu0 %v1359_v0 }
 0x2c1   :  { %1203 = vmatpush3.msra.mxu0 %v623_v17 }
 0x2c2   :  { %1204 = vmatprep.subr.mxu0 %v1359_v0 }
 0x2c3   :  { %1205 = vmatpush3.msra.mxu0 %v622_v19 }
 0x2c4   :  { %1206 = vmatprep.subr.mxu0 %v1359_v0 }
 0x2c5   :  { %v613_v23 = vpop.f32.mrf.mxu1  ;;  %1207 = vmatpush3.msra.mxu0 %v621_v21 }
 0x2c6   :  { %v614_v24 = vadd.f32 %v613_v23, %v546_v20  ;;  %1208 = vmatprep.subr.mxu0 %v1359_v0 }
 0x2c7   :  { %v1179_v26 = vpop.f32.mrf.mxu1  ;;  %1209 = vmatpush3.msra.mxu0 %v620_v22 }
 0x2c8   :  { %v617_v27 = vmax.f32 %v614_v24, 0.0  ;;  %1210 = vmatprep.subr.mxu0 %v1359_v0  ;;  %v638_v0 = vrot.slane %v1451_v53, %v637_v57 }
 0x2c9   :  { %1211 = vmatpush3.msra.mxu0 %v619_v25 }
 0x2ca   :  { %1213 = vmatmul.mubr.f32.vlgmr.msra.gmra.mxu0 %v617_v27 }
 0x36a   :  { %v512_v46 = vpop.f32.mrf.mxu0 }
 0x36b   :  { %v513_v47 = vadd.f32 %v512_v46, %v445_v45 }
 0x36c   :  { %v1144_v48 = vpop.f32.mrf.mxu0 }
 0x36d   :  { %v516_v49 = vand.u32 2147483647, %v513_v47  ;;  %vm520_vm1 = vcmp.ge.f32.partialorder %v513_v47, 0.0 }
 0x36f   :  { %v517_v52 = vsub.f32 0.0, %v516_v49 }
 0x371   :  { %v518_v54 = vmul.f32 1.442695, %v517_v52 }
 0x373   :  { %1260 = vpow2.f32 %v518_v54 }
 0x380   :  { %v1261_v55 = vpop.eup %1260 }
 0x381   :  { %v521_v56 = vadd.f32 1.0, %v1261_v55 }
 0x383   :  { %1262 = vrcp.f32 %v521_v56 }
 0x38a   :  { %v705_v58 = vpop.f32.mrf.mxu0 }
 0x38b   :  { %v706_v59 = vadd.f32 %v705_v58, %v638_v0 }
 0x38c   :  { %v1214_v60 = vpop.f32.mrf.mxu0 }
 0x38d   :  { %v709_v61 = vmax.f32 %v706_v59, 0.0 }
 0x38f   :  { %1248 = vmatmul.mubr.f32.vlgmr.msra.gmra.mxu1 %v709_v61 }
 0x390   :  { %v1263_v62 = vpop.eup %1262 }
 0x391   :  { %v524_v63 = vmul.f32 %v1263_v62, %v1261_v55 }
 0x393   :  { %v525_v1 = vsel %vm520_vm1, %v1263_v62, %v524_v63 }
 0x394   :  { %816 = vst [vmem:[#allocation8 + $0x10] sm:$0xff] %v525_v1 }
 0x44f   :  { %v797_v5 = vpop.f32.mrf.mxu1 }
 0x450   :  { %v798_v6 = vadd.f32 %v797_v5, %v730_v4 }
 0x451   :  { %v1249_v7 = vpop.f32.mrf.mxu1 }
 0x452   :  { %v804_v8 = vsel %vm803_vm2, %v798_v6, -1e+30 }
 0x453   :  { %805 = vmax.xlane.f32.xlu0 %v804_v8 }
 0x4dc   :  { %v806_v9 = vpop.xlane.xlu0 %805 }
 0x4dd   :  { %v807_v10 = vsub.f32 %v804_v8, %v806_v9 }
 0x4df   :  { %v808_v11 = vmul.f32 1.442695, %v807_v10 }
 0x4e1   :  { %1264 = vpow2.f32 %v808_v11 }
 0x4ee   :  { %v1265_v12 = vpop.eup %1264 }
 0x4ef   :  { %810 = vadd.xlane.f32.xlu0 %v1265_v12 }
 0x578   :  { %v811_v13 = vpop.xlane.xlu0 %810 }
 0x579   :  { %1266 = vrcp.f32 %v811_v13 }
 0x586   :  { %v1267_v51 = vpop.eup %1266 }
 0x587   :  { %v813_v50 = vmul.f32 %v1267_v51, %v1265_v12 }
 0x589   :  { %817 = vst [vmem:[#allocation8 + $0x18] sm:$0xff] %v813_v50 }
 0x58a   :  { %1339 = shalt.err (!%p1336_p5)
}
 0x58b   :  { %827 = dma.vmem_to_hbm [thread:$0]  %s825_s2, 512, %s1563_s3, [#allocation4]  }
 0x58c   :  { %1352 = dma.done.wait [#allocation4], 512  }
 0x58d   :  { %1353 = vsyncadd [#allocation4], 4294966784 }
 0x58e   :  { %831 = vsyncpa [#allocation3], 1 }
 0x58f   :  { %832 = vsyncpa [#allocation6], 1 }
 0x590   :  { %833 = vsyncpa [#allocation4], 1 }

</bundles_post_ra>
